<compile_context>
chip_gen: v7x
topology: tpu7x:2x2x1
jax: 0.10.0
libtpu: 0.0.40
codegen_flags: <defaults>
</compile_context>

<pallas_src>
import functools

import jax
import jax.numpy as jnp
import numpy as np
from jax.experimental import pallas as pl
from jax.experimental.pallas import tpu as pltpu

EPS = 1e-15
LANE = 128


def _round_up(v, m):
    return ((v + m - 1) // m) * m


def _vmem_limit(nbytes):
    # nbytes: caller's estimate of double-buffered blocks + scratch + temporaries.
    # Add headroom, stay <= 40 MiB so the kernels also fit v7x's 64 MiB VMEM.
    return int(min(max(nbytes + (8 << 20), 16 << 20), 40 << 20))


# ---------------------------------------------------------------------------
# Kernel A: per-node transform   xg = act(h) @ g ,  rp = act(h) @ root + bias
# ---------------------------------------------------------------------------
def node_transform_kernel(h_ref, g_ref, root_ref, bias_ref, xg_ref, rp_ref,
                          *, apply_elu, compute_dtype):
    h = h_ref[...].astype(jnp.float32)
    if apply_elu:
        # h = dropout(elu(h)); dropout(p=0.5) is identity in eval mode.
        h = jnp.where(h > 0, h, jnp.expm1(jnp.minimum(h, 0.0)))
    hc = h.astype(compute_dtype)
    xg_ref[...] = jnp.dot(hc, g_ref[...],
                          preferred_element_type=jnp.float32).astype(xg_ref.dtype)
    rp = jnp.dot(hc, root_ref[...], preferred_element_type=jnp.float32)
    rp_ref[...] = (rp + bias_ref[...]).astype(rp_ref.dtype)


def node_transform_pallas(h, g, root, bias, *, apply_elu, compute_dtype, tn):
    npad, fin = h.shape
    kmp = g.shape[1]
    mp = root.shape[1]
    cb = jnp.dtype(compute_dtype).itemsize
    nbytes = 2 * (tn * fin * 4 + fin * kmp * cb + fin * mp * cb + mp * 4
                  + tn * kmp * cb + tn * mp * 4) + 4 * tn * max(kmp, fin) * 4
    kernel = functools.partial(node_transform_kernel, apply_elu=apply_elu,
                               compute_dtype=compute_dtype)
    return pl.pallas_call(
        kernel,
        out_shape=(jax.ShapeDtypeStruct((npad, kmp), compute_dtype),
                   jax.ShapeDtypeStruct((npad, mp), jnp.float32)),
        grid=(npad // tn,),
        in_specs=[pl.BlockSpec((tn, fin), lambda i: (i, 0)),
                  pl.BlockSpec((fin, kmp), lambda i: (0, 0)),
                  pl.BlockSpec((fin, mp), lambda i: (0, 0)),
                  pl.BlockSpec((1, mp), lambda i: (0, 0))],
        out_specs=(pl.BlockSpec((tn, kmp), lambda i: (i, 0)),
                   pl.BlockSpec((tn, mp), lambda i: (i, 0))),
        compiler_params=pltpu.CompilerParams(
            dimension_semantics=("parallel",),
            vmem_limit_bytes=_vmem_limit(nbytes)),
    )(h, g, root, bias)


# ---------------------------------------------------------------------------
# Kernel B: per-edge messages (runs once per edge tile — not per node tile)
# ---------------------------------------------------------------------------
def edge_message_kernel(ea_ref, wp_ref, bp_ref, qa_ref, qb_ref, qc_ref,
                        eexp_ref, red_ref, xg_ref, msg_ref, *, dim, n_kernels):
    ea = ea_ref[...].astype(jnp.float32)                       # [TE, 2]
    wp = wp_ref[...]                                           # [2, dim]
    # pseudo = tanh(Linear(2 -> dim)), entirely on the VPU.
    pseudo = jnp.tanh(ea[:, 0:1] * wp[0:1, :] + ea[:, 1:2] * wp[1:2, :]
                      + bp_ref[...])                           # [TE, dim]

    # Gaussian mixture weights via a VPU-unrolled quadratic expansion
    # (no tiny depth-`dim` MXU dots) followed by a single exp on [TE, K].
    logits = jnp.zeros((ea.shape[0], n_kernels), jnp.float32) + qc_ref[...]
    for d in range(dim):
        pd = pseudo[:, d:d + 1]
        logits = logits + (pd * pd) * qa_ref[d:d + 1, :] + pd * qb_ref[d:d + 1, :]
    w = jnp.exp(logits)                                        # [TE, K]

    # Expand w over the packed (k, m) lane layout (VPU), weight the gathered
    # source features, then group-reduce over k with one 128-deep MXU matmul.
    xj = xg_ref[...].astype(jnp.float32)                       # [TE, KMp]
    w_exp = jnp.zeros_like(xj)
    for k in range(n_kernels):
        w_exp = w_exp + w[:, k:k + 1] * eexp_ref[k:k + 1, :]
    msg_ref[...] = jnp.dot(xj * w_exp, red_ref[...],
                           preferred_element_type=jnp.float32)  # [TE, Mp] f32


def edge_message_pallas(ea, wp, bp, qa, qb, qc, eexp, red, xg_src,
                        *, te, dim, n_kernels, mp, compute_dtype):
    epad = ea.shape[0]
    kmp = xg_src.shape[1]
    cb = jnp.dtype(compute_dtype).itemsize
    nbytes = 2 * (te * LANE * 4 + te * kmp * cb + te * mp * 4
                  + n_kernels * kmp * 4 + kmp * mp * 4) + 6 * te * kmp * 4
    kernel = functools.partial(edge_message_kernel, dim=dim, n_kernels=n_kernels)
    return pl.pallas_call(
        kernel,
        out_shape=jax.ShapeDtypeStruct((epad, mp), jnp.float32),
        grid=(epad // te,),
        in_specs=[
            pl.BlockSpec((te, ea.shape[1]), lambda e: (e, 0)),   # edge_attr tile
            pl.BlockSpec(wp.shape, lambda e: (0, 0)),            # Linear(2,dim) W
            pl.BlockSpec(bp.shape, lambda e: (0, 0)),            # Linear(2,dim) b
            pl.BlockSpec(qa.shape, lambda e: (0, 0)),            # quad A [dim,K]
            pl.BlockSpec(qb.shape, lambda e: (0, 0)),            # quad B [dim,K]
            pl.BlockSpec(qc.shape, lambda e: (0, 0)),            # quad c [1,K]
            pl.BlockSpec(eexp.shape, lambda e: (0, 0)),          # expand [K,KMp]
            pl.BlockSpec(red.shape, lambda e: (0, 0)),           # reduce [KMp,Mp]
            pl.BlockSpec((te, kmp), lambda e: (e, 0)),           # xg[src] tile
        ],
        out_specs=pl.BlockSpec((te, mp), lambda e: (e, 0)),
        compiler_params=pltpu.CompilerParams(
            dimension_semantics=("parallel",),
            vmem_limit_bytes=_vmem_limit(nbytes)),
    )(ea, wp, bp, qa, qb, qc, eexp, red, xg_src)


# ---------------------------------------------------------------------------
# Kernel C: mean scatter of messages onto target nodes (+ fused log_softmax)
# ---------------------------------------------------------------------------
def scatter_aggregate_kernel(tmin_ref, tmax_ref, tgt_ref, msg_ref, dinv_ref,
                             rp_ref, out_ref, acc_ref,
                             *, tn, te, out_valid, final_log_softmax):
    i = pl.program_id(0)
    e = pl.program_id(1)

    @pl.when(e == 0)
    def _():
        acc_ref[...] = jnp.zeros_like(acc_ref)

    base = i * tn
    # Edges are target-sorted in glue: skip edge tiles whose target range cannot
    # intersect this node tile (segment-style accumulation).
    overlaps = jnp.logical_and(tmin_ref[e] < base + tn, tmax_ref[e] >= base)

    @pl.when(overlaps)
    def _():
        tgt = tgt_ref[...]                                           # [1, TE] int32
        rows = base + jax.lax.broadcasted_iota(jnp.int32, (tn, te), 0)
        # One-hot built in-kernel; 1/deg (mean aggregation) folded into it.
        oh = (tgt == rows).astype(jnp.float32) * dinv_ref[...]       # [TN, TE] f32
        acc_ref[...] += jnp.dot(oh, msg_ref[...],
                                preferred_element_type=jnp.float32)

    @pl.when(e == pl.num_programs(1) - 1)
    def _():
        out = acc_ref[...] + rp_ref[...]
        if final_log_softmax:
            col = jax.lax.broadcasted_iota(jnp.int32, out.shape, 1)
            valid = col < out_valid
            z = jnp.where(valid, out, -1e30)
            m = jnp.max(z, axis=-1, keepdims=True)
            s = z - m
            p = jnp.where(valid, jnp.exp(s), 0.0)
            out = s - jnp.log(jnp.sum(p, axis=-1, keepdims=True))
        out_ref[...] = out.astype(out_ref.dtype)


def scatter_aggregate_pallas(tile_tmin, tile_tmax, tgt_row, msg, deg_inv, rp,
                             *, tn, te, mp, out_valid, final_log_softmax):
    npad = rp.shape[0]
    epad = msg.shape[0]
    nbytes = (2 * (8 * te * 4 + te * mp * 4 + tn * LANE * 4 + 2 * tn * mp * 4)
              + tn * mp * 4 + 6 * tn * te * 4)
    kernel = functools.partial(scatter_aggregate_kernel, tn=tn, te=te,
                               out_valid=out_valid,
                               final_log_softmax=final_log_softmax)
    grid_spec = pltpu.PrefetchScalarGridSpec(
        num_scalar_prefetch=2,
        grid=(npad // tn, epad // te),
        in_specs=[
            pl.BlockSpec((1, te), lambda i, e, tmin, tmax: (0, e)),    # target ids
            pl.BlockSpec((te, mp), lambda i, e, tmin, tmax: (e, 0)),   # messages
            pl.BlockSpec((tn, 1), lambda i, e, tmin, tmax: (i, 0)),    # 1/deg
            pl.BlockSpec((tn, mp), lambda i, e, tmin, tmax: (i, 0)),   # root + bias
        ],
        out_specs=pl.BlockSpec((tn, mp), lambda i, e, tmin, tmax: (i, 0)),
        scratch_shapes=[pltpu.VMEM((tn, mp), jnp.float32)],
    )
    return pl.pallas_call(
        kernel,
        out_shape=jax.ShapeDtypeStruct((npad, mp), jnp.float32),
        grid_spec=grid_spec,
        compiler_params=pltpu.CompilerParams(
            dimension_semantics=("parallel", "arbitrary"),
            vmem_limit_bytes=_vmem_limit(nbytes)),
    )(tile_tmin, tile_tmax, tgt_row, msg, deg_inv, rp)


# ---------------------------------------------------------------------------
# Glue: parameter packing + gaussian-coefficient precompute (loop invariant)
# ---------------------------------------------------------------------------
def prep_gmm_params(p, in_dim, mp, kmp):
    in_ch, m = p["root"].shape
    k = p["mu"].shape[0]
    # Packed g: column (k*m + j); K*M lanes rounded up to kmp (no per-k 128 pad).
    gp = jnp.zeros((in_dim, kmp), jnp.float32).at[:in_ch, :k * m].set(p["g"])
    rootp = jnp.zeros((in_dim, mp), jnp.float32).at[:in_ch, :m].set(p["root"])
    biasp = jnp.zeros((1, mp), jnp.float32).at[:, :m].set(p["bias"])
    # Gaussian kernel as a quadratic form in pseudo.
    inv = 1.0 / (EPS + p["sigma"] ** 2)                            # [K, dim]
    qa = (-0.5 * inv).T                                            # [dim, K]
    qb = (p["mu"] * inv).T                                         # [dim, K]
    qc = (-0.5 * jnp.sum(p["mu"] ** 2 * inv, axis=-1))[None, :]    # [1, K]
    # Lane-expansion (K -> packed K*M) and group-reduce (packed K*M -> M) 0/1 maps.
    cols = jnp.arange(kmp)[None, :]
    kk = jnp.arange(k)[:, None]
    eexp = ((cols >= kk * m) & (cols < (kk + 1) * m)).astype(jnp.float32)   # [K, KMp]
    rr = jnp.arange(kmp)[:, None]
    cc = jnp.arange(mp)[None, :]
    red = ((rr % m == cc) & (rr < k * m) & (cc < m)).astype(jnp.float32)    # [KMp, Mp]
    return dict(g=gp, root=rootp, bias=biasp, wp=p["wp"], bp=p["bp"],
                qa=qa, qb=qb, qc=qc, eexp=eexp, red=red, m=m, k=k)


def monet_forward(x, edge_index, edge_attr, params_list, *, use_bf16=False,
                  node_tile=512, edge_tile=256):
    compute_dtype = jnp.bfloat16 if use_bf16 else jnp.float32
    n = x.shape[0]
    e = edge_attr.shape[0]

    np0 = _round_up(max(n, 8), 8)
    tn = node_tile if np0 >= node_tile else np0
    npad = _round_up(n, tn)
    ep0 = _round_up(max(e, LANE), LANE)
    te = edge_tile if ep0 >= edge_tile else ep0
    epad = _round_up(e, te)

    src = edge_index[0].astype(jnp.int32)
    tgt = edge_index[1].astype(jnp.int32)

    # ---- graph glue (layer-invariant, computed once) -------------------------
    # Padding invariant (kernels rely on it):
    #   * padded node rows [n, npad) are never the source of a real edge and never
    #     a target; their values stay finite and are sliced off at the end.
    #   * padded edges use tgt = npad (matches no node row -> zero scatter) and
    #     src = 0 (gather stays in range; contribution is killed by the scatter).
    x_p = jnp.zeros((npad, x.shape[1]), jnp.float32).at[:n].set(x)
    ea_p = jnp.zeros((epad, edge_attr.shape[1]), jnp.float32).at[:e].set(edge_attr)
    src_p = jnp.zeros((epad,), jnp.int32).at[:e].set(src)
    tgt_p = jnp.full((epad,), npad, jnp.int32).at[:e].set(tgt)
    valid = jnp.arange(epad) < e

    # Sort edges by target so the scatter kernel can skip non-overlapping tiles.
    order = jnp.argsort(tgt_p)
    ea_s = ea_p[order]
    src_s = src_p[order]
    tgt_s = tgt_p[order]
    valid_s = valid[order]

    n_et = epad // te
    big = jnp.int32(2 ** 30)
    tile_tmin = jnp.min(jnp.where(valid_s, tgt_s, big).reshape(n_et, te),
                        axis=1).astype(jnp.int32)
    tile_tmax = jnp.max(jnp.where(valid_s, tgt_s, -1).reshape(n_et, te),
                        axis=1).astype(jnp.int32)
    tgt_row = tgt_s[None, :]                                     # [1, epad] int32

    deg = jax.ops.segment_sum(jnp.ones((e,), jnp.float32), tgt, npad)
    deg_inv = (1.0 / jnp.maximum(deg, 1.0))[:, None]             # [npad, 1] f32

    h = x_p
    n_layers = len(params_list)
    for i, raw in enumerate(params_list):
        m = raw["root"].shape[1]
        k = raw["mu"].shape[0]
        dim = raw["wp"].shape[1]
        mp = _round_up(m, LANE)
        kmp = _round_up(k * m, LANE)
        pp = prep_gmm_params(raw, h.shape[1], mp, kmp)

        xg, rp = node_transform_pallas(
            h, pp["g"].astype(compute_dtype), pp["root"].astype(compute_dtype),
            pp["bias"], apply_elu=(i != 0), compute_dtype=compute_dtype, tn=tn)

        # Index-driven per-edge source gather (XLA gather in glue, O(E*KMp)).
        # TODO(synk): fuse into edge_message_kernel with a manual DMA row gather.
        xg_src = jnp.take(xg, src_s, axis=0)

        msg = edge_message_pallas(
            ea_s, pp["wp"], pp["bp"], pp["qa"], pp["qb"], pp["qc"],
            pp["eexp"], pp["red"], xg_src,
            te=te, dim=dim, n_kernels=k, mp=mp, compute_dtype=compute_dtype)

        h = scatter_aggregate_pallas(
            tile_tmin, tile_tmax, tgt_row, msg, deg_inv, rp,
            tn=tn, te=te, mp=mp, out_valid=m,
            final_log_softmax=(i == n_layers - 1))

    out_feats = params_list[-1]["bias"].shape[-1]
    return h[:n, :out_feats]


# ---------------------------------------------------------------------------
# Parameter init (deterministic, synthetic — no checkpoint loading)
# ---------------------------------------------------------------------------
def init_gmm_params(key, in_ch, out_ch, dim, n_kernels):
    ks = jax.random.split(key, 7)
    s = 0.1
    return dict(
        wp=jax.random.normal(ks[0], (2, dim), jnp.float32) * s,      # Linear(2, dim)
        bp=jax.random.normal(ks[1], (1, dim), jnp.float32) * s,
        mu=jax.random.normal(ks[2], (n_kernels, dim), jnp.float32),
        sigma=jax.random.uniform(ks[3], (n_kernels, dim), jnp.float32,
                                 minval=0.5, maxval=1.5),
        g=jax.random.normal(ks[4], (in_ch, n_kernels * out_ch), jnp.float32) * s,
        root=jax.random.normal(ks[5], (in_ch, out_ch), jnp.float32) * s,
        bias=jax.random.normal(ks[6], (1, out_ch), jnp.float32) * s,
    )


# ---------------------------------------------------------------------------
# Pure-JAX reference for correctness checking
# ---------------------------------------------------------------------------
def ref_gmm_conv(h, src, tgt, edge_attr, p, n):
    pseudo = jnp.tanh(edge_attr @ p["wp"] + p["bp"])
    xg = h @ p["g"]
    xj = xg[src]
    e = src.shape[0]
    k = p["mu"].shape[0]
    m = p["bias"].shape[-1]
    diff = pseudo[:, None, :] - p["mu"][None]
    gauss = jnp.exp(-0.5 * jnp.sum(diff ** 2 / (EPS + p["sigma"][None] ** 2), axis=-1))
    msg = jnp.sum(xj.reshape(e, k, m) * gauss[:, :, None], axis=1)
    summ = jax.ops.segment_sum(msg, tgt, n)
    cnt = jax.ops.segment_sum(jnp.ones((e,), jnp.float32), tgt, n)
    aggr = summ / jnp.maximum(cnt, 1.0)[:, None]
    return aggr + h @ p["root"] + p["bias"]


def ref_forward(x, edge_index, edge_attr, params_list):
    n = x.shape[0]
    src, tgt = edge_index[0], edge_index[1]
    h = x
    for i, p in enumerate(params_list):
        if i != 0:
            h = jax.nn.elu(h)  # dropout = identity (eval mode)
        h = ref_gmm_conv(h, src, tgt, edge_attr, p, n)
    return jax.nn.log_softmax(h, axis=1)


# ---------------------------------------------------------------------------
def _make_graph(key, n, e, in_feats):
    k_x, k_s, k_t, k_e = jax.random.split(key, 4)
    x = jax.random.normal(k_x, (n, in_feats), jnp.float32)
    src = jax.random.randint(k_s, (e,), 0, n)
    tgt = jax.random.randint(k_t, (e,), 0, n)
    edge_index = jnp.stack([src, tgt])              # [2, E] (row0=src, row1=tgt)
    edge_attr = jax.random.normal(k_e, (e, 2), jnp.float32)
    return x, edge_index, edge_attr


if __name__ == "__main__":
    key = jax.random.PRNGKey(0)
    in_feats, n_hidden, out_feats, dim, n_kernels = 16, 32, 8, 4, 3

    k_g1, k_g2, k_p0, k_p1 = jax.random.split(key, 4)
    params = [
        init_gmm_params(k_p0, in_feats, n_hidden, dim, n_kernels),
        init_gmm_params(k_p1, n_hidden, out_feats, dim, n_kernels),
    ]

    # --- small single-tile graph ------------------------------------------------
    x, edge_index, edge_attr = _make_graph(k_g1, 32, 64, in_feats)
    ref = jax.block_until_ready(ref_forward(x, edge_index, edge_attr, params))

    out_f32 = jax.block_until_ready(
        monet_forward(x, edge_index, edge_attr, params, use_bf16=False))
    np.testing.assert_allclose(np.asarray(out_f32), np.asarray(ref),
                               rtol=2e-4, atol=2e-4)

    out_bf16 = jax.block_until_ready(
        monet_forward(x, edge_index, edge_attr, params, use_bf16=True))
    np.testing.assert_allclose(np.asarray(out_bf16), np.asarray(ref),
                               rtol=1e-1, atol=1e-1)

    # --- larger graph: exercises multi-edge-tile accumulation, target-sorted
    # tile skipping, and padded node rows ----------------------------------------
    x2, edge_index2, edge_attr2 = _make_graph(k_g2, 300, 900, in_feats)
    ref2 = jax.block_until_ready(ref_forward(x2, edge_index2, edge_attr2, params))
    out2 = jax.block_until_ready(
        monet_forward(x2, edge_index2, edge_attr2, params, use_bf16=False))
    np.testing.assert_allclose(np.asarray(out2), np.asarray(ref2),
                               rtol=1e-3, atol=1e-3)

    print("KERNEL_OK")
</pallas_src>

<mosaic_0001>
module attributes {stable_mosaic.version = 11 : i64} {
  func.func @node_transform_kernel(%arg0: i32, %arg1: memref<32x16xf32, #tpu.memory_space<vmem>>, %arg2: memref<16x128xf32, #tpu.memory_space<vmem>>, %arg3: memref<16x128xf32, #tpu.memory_space<vmem>>, %arg4: memref<1x128xf32, #tpu.memory_space<vmem>>, %arg5: memref<32x128xf32, #tpu.memory_space<vmem>>, %arg6: memref<32x128xf32, #tpu.memory_space<vmem>>) attributes {dimension_semantics = [#tpu.dimension_semantics<parallel>], iteration_bounds = array<i64: 1>, scalar_prefetch = 0 : i64, scratch_operands = 0 : i64, tpu.core_type = #tpu.core_type<tc>, window_params = [{transform_indices = @transform_0, window_bounds = array<i64: 32, 16>}, {pipeline_mode = #tpu.pipeline_mode<synchronous>, transform_indices = @transform_1, window_bounds = array<i64: 16, 128>}, {pipeline_mode = #tpu.pipeline_mode<synchronous>, transform_indices = @transform_2, window_bounds = array<i64: 16, 128>}, {pipeline_mode = #tpu.pipeline_mode<synchronous>, transform_indices = @transform_3, window_bounds = array<i64: 1, 128>}, {transform_indices = @transform_4, window_bounds = array<i64: 32, 128>}, {transform_indices = @transform_5, window_bounds = array<i64: 32, 128>}]} {
    %c0 = arith.constant 0 : index
    %c0_0 = arith.constant 0 : index
    %0 = vector.load %arg1[%c0, %c0_0] : memref<32x16xf32, #tpu.memory_space<vmem>>, vector<32x16xf32>
    %c0_1 = arith.constant 0 : index
    %c0_2 = arith.constant 0 : index
    %1 = vector.load %arg2[%c0_1, %c0_2] : memref<16x128xf32, #tpu.memory_space<vmem>>, vector<16x128xf32>
    %cst = arith.constant dense<0.000000e+00> : vector<32x128xf32>
    %2 = tpu.matmul %0, %1, %cst {dimension_numbers = #tpu.dot_dimension_numbers<[1], [0], [0], [1], [0, 0, 1, 1], [], []>} : vector<32x16xf32>, vector<16x128xf32>, vector<32x128xf32> -> vector<32x128xf32>
    %c0_3 = arith.constant 0 : index
    %c0_4 = arith.constant 0 : index
    %3 = vector.load %arg5[%c0_3, %c0_4] : memref<32x128xf32, #tpu.memory_space<vmem>>, vector<32x128xf32>
    tpu.vector_store %arg5[%c0_3, %c0_4], %2 {strides = array<i32>} : memref<32x128xf32, #tpu.memory_space<vmem>>, vector<32x128xf32>,
    %c0_5 = arith.constant 0 : index
    %c0_6 = arith.constant 0 : index
    %4 = vector.load %arg3[%c0_5, %c0_6] : memref<16x128xf32, #tpu.memory_space<vmem>>, vector<16x128xf32>
    %cst_7 = arith.constant dense<0.000000e+00> : vector<32x128xf32>
    %5 = tpu.matmul %0, %4, %cst_7 {dimension_numbers = #tpu.dot_dimension_numbers<[1], [0], [0], [1], [0, 0, 1, 1], [], []>} : vector<32x16xf32>, vector<16x128xf32>, vector<32x128xf32> -> vector<32x128xf32>
    %c0_8 = arith.constant 0 : index
    %c0_9 = arith.constant 0 : index
    %6 = vector.load %arg4[%c0_8, %c0_9] : memref<1x128xf32, #tpu.memory_space<vmem>>, vector<1x128xf32>
    %7 = vector.broadcast %6 : vector<1x128xf32> to vector<32x128xf32>
    %8 = arith.addf %5, %7 : vector<32x128xf32>
    %c0_10 = arith.constant 0 : index
    %c0_11 = arith.constant 0 : index
    %9 = vector.load %arg6[%c0_10, %c0_11] : memref<32x128xf32, #tpu.memory_space<vmem>>, vector<32x128xf32>
    tpu.vector_store %arg6[%c0_10, %c0_11], %8 {strides = array<i32>} : memref<32x128xf32, #tpu.memory_space<vmem>>, vector<32x128xf32>,
    return
  }
  func.func @transform_0(%arg0: i32) -> (i32, i32) {
    %c0_i32 = arith.constant 0 : i32
    %c0_i32_0 = arith.constant 0 : i32
    return %arg0, %c0_i32 : i32, i32
  }
  func.func @transform_1(%arg0: i32) -> (i32, i32) {
    %c0_i32 = arith.constant 0 : i32
    %c0_i32_0 = arith.constant 0 : i32
    %c0_i32_1 = arith.constant 0 : i32
    return %c0_i32, %c0_i32_0 : i32, i32
  }
  func.func @transform_2(%arg0: i32) -> (i32, i32) {
    %c0_i32 = arith.constant 0 : i32
    %c0_i32_0 = arith.constant 0 : i32
    %c0_i32_1 = arith.constant 0 : i32
    return %c0_i32, %c0_i32_0 : i32, i32
  }
  func.func @transform_3(%arg0: i32) -> (i32, i32) {
    %c0_i32 = arith.constant 0 : i32
    %c0_i32_0 = arith.constant 0 : i32
    %c0_i32_1 = arith.constant 0 : i32
    return %c0_i32, %c0_i32_0 : i32, i32
  }
  func.func @transform_4(%arg0: i32) -> (i32, i32) {
    %c0_i32 = arith.constant 0 : i32
    %c0_i32_0 = arith.constant 0 : i32
    return %arg0, %c0_i32 : i32, i32
  }
  func.func @transform_5(%arg0: i32) -> (i32, i32) {
    %c0_i32 = arith.constant 0 : i32
    %c0_i32_0 = arith.constant 0 : i32
    return %arg0, %c0_i32 : i32, i32
  }
}

</mosaic_0001>

<bundles_post_ra>
// kernel: tpu_custom_call.1
= control target key start
LH: loop header
LB: loop body
LE: loop exit
PB: predicated region body
PF: predicated region fallthrough
CT: control target
= control target key end

     0   :  { %11 = vsyncpa [#allocation3], 0  ;;  %vm27_vm0 = vcmask 130048   ;;  %s460_s0 = inlined_call_operand.vmem [shape: f32[32,16], index: 0, kind: input, shape index: {}]   ;;  %s461_s1 = inlined_call_operand.vmem [shape: f32[16,128], index: 1, kind: input, shape index: {}]   ;;  %s462_s2 = inlined_call_operand.vmem [shape: f32[16,128], index: 2, kind: input, shape index: {}]   ;;  %s463_s3 = inlined_call_operand.vmem [shape: f32[1,128], index: 3, kind: input, shape index: {}]   ;;  %s464_s4 = inlined_call_operand.hbm [shape: f32[32,128], index: 4, kind: output, shape index: {0}]   ;;  %s465_s5 = inlined_call_operand.hbm [shape: f32[32,128], index: 5, kind: output, shape index: {1}]  }
   0x1   :  { %v129_v0 = vld [vmem:[%s462_s2] sm:$0xff]  ;;  %v130_v1 = vld [vmem:[%s462_s2 + $0x8] sm:$0xff] }
   0x2   :  { %v25_v2 = vld [vmem:[%s461_s1] sm:$0xff]  ;;  %v304_v3 = vpack.c.bf16 %v130_v1, %v129_v0  ;;  %v26_v4 = vld [vmem:[%s461_s1 + $0x8] sm:$0xff] }
   0x3   :  { %v21_v5 = vld [vmem:[%s460_s0] sm:$0xff]  ;;  %v300_v6 = vpack.c.bf16 %v26_v4, %v25_v2 }
   0x4   :  { %294 = vmatprep.mubr.msk.f32.mxu1 %vm27_vm0, %v21_v5  ;;  %284 = vmatprep.mubr.msk.f32.mxu0 %vm27_vm0, %v21_v5 }
   0x5   :  { %12 = vsyncpa [#allocation5], 0  ;;  %305 = vmatprep.subr.bf16.mxu1 %v304_v3  ;;  %301 = vmatprep.subr.bf16.mxu0 %v300_v6  ;;  %v22_v7 = vld [vmem:[%s460_s0 + $0x8] sm:$0xff]  ;;  %v23_v8 = vld [vmem:[%s460_s0 + $0x10] sm:$0xff]  ;;  %s360_s9 = smov [#allocation2]  }
   0x6   :  { %307 = vmatpush3.bf16.msra.mxu1 %v304_v3  ;;  %303 = vmatpush3.bf16.msra.mxu0 %v300_v6  ;;  %v24_v9 = vld [vmem:[%s460_s0 + $0x18] sm:$0xff]  ;;  %v263_v10 = vld [vmem:[%s463_s3] ss:$0 sm:$0xff]  ;;  %s232_s10 = sshll.u32 %s360_s9, 4  ;;  %s361_s0 = smov [#allocation4]   ;;  %s233_s10 = int_to_ptr.vmem [resolvable:$true] %s232_s10 }
   0x7   :  { %s244_s11 = sshll.u32 %s361_s0, 4  ;;  %s312_s3 = scalar_lea.vmem %s233_s10, 512  ;;  %s429_s11 = int_to_ptr.vmem [resolvable:$true] %s244_s11 }
   0x8   :  { %p313_p0 = scmp.ne.s32.totalorder %s233_s10, %s312_s3  ;;  %p317_p1 = scmp.lt.s32.totalorder %s233_s10, %s233_s10 }
   0x9   :  { %295 = vmatmul.mubr.msk.f32.vlgmr.msra.gmra.mrb[0].mxu1 %vm27_vm0, %v22_v7  ;;  %285 = vmatmul.mubr.msk.f32.vlgmr.msra.gmra.mrb[0].mxu0 %vm27_vm0, %v22_v7  ;;  %p318_p2 = scmp.lt.s32.totalorder %s312_s3, %s312_s3 }
   0xa   :  { %297 = vmatprep.mubr.msk.f32.mxu1 %vm27_vm0, %v23_v8  ;;  %287 = vmatprep.mubr.msk.f32.mxu0 %vm27_vm0, %v23_v8 }
   0xb   :  { %p319_p3 = por %p318_p2, %p317_p1 }
   0xd   :  { %298 = vmatmul.mubr.msk.f32.gmra.mrb[2].mxu1 %vm27_vm0, %v24_v9  ;;  %288 = vmatmul.mubr.msk.f32.gmra.mrb[2].mxu0 %vm27_vm0, %v24_v9  ;;  %p320_p4 = pnand %p319_p3, %p313_p0 }
  0xdc   :  { %v296_v11 = vpop.f32.mrb[0].mxu1  ;;  %v286_v13 = vpop.f32.mrb[0].mxu0 }
  0xdd   :  { %v210_v12 = vadd.f32 %v296_v11, %v263_v10  ;;  %v204_v14 = vpop.f32.mrb[1].mxu1  ;;  %126 = vst [vmem:[#allocation2 + $0x8] sm:$0xff] %v286_v13  ;;  %v106_v16 = vpop.f32.mrb[1].mxu0 }
  0xde   :  { %v205_v15 = vadd.f32 %v263_v10, %v204_v14  ;;  %125 = vst [vmem:[#allocation2] sm:$0xff] %v106_v16 }
  0xdf   :  { %224 = vst [vmem:[#allocation4 + $0x8] sm:$0xff] %v210_v12 }
  0xe0   :  { %223 = vst [vmem:[#allocation4] sm:$0xff] %v205_v15  ;;  %v299_v17 = vpop.f32.mrb[2].mxu1  ;;  %v289_v19 = vpop.f32.mrb[2].mxu0 }
  0xe1   :  { %v220_v18 = vadd.f32 %v299_v17, %v263_v10  ;;  %v214_v20 = vpop.f32.mrb[3].mxu1  ;;  %128 = vst [vmem:[#allocation2 + $0x18] sm:$0xff] %v289_v19  ;;  %v116_v22 = vpop.f32.mrb[3].mxu0 }
  0xe2   :  { %v215_v21 = vadd.f32 %v263_v10, %v214_v20  ;;  %127 = vst [vmem:[#allocation2 + $0x10] sm:$0xff] %v116_v22 }
  0xe3   :  { %226 = vst [vmem:[#allocation4 + $0x18] sm:$0xff] %v220_v18 }
  0xe4   :  { %225 = vst [vmem:[#allocation4 + $0x10] sm:$0xff] %v215_v21 }
  0xe5   :  { %323 = shalt.err (!%p320_p4)
}
  0xe6   :  { %s324_s14 = scalar_lea.hbm %s464_s4, 512 }
  0xe7   :  { %p325_p5 = scmp.ne.s32.totalorder %s464_s4, %s324_s14  ;;  %p328_p6 = scmp.lt.u32.totalorder %s324_s14, %s464_s4 }
  0xe9   :  { %p330_p7 = pnand %p328_p6, %p325_p5 }
  0xeb   :  { %333 = shalt.err (!%p330_p7)
}
  0xec   :  { %s362_s19 = smov 128   ;;  %s363_s20 = smov 8  }
  0xed   :  { %238 = dma.vmem_to_hbm [thread:$0]  %s233_s10, 512, %s464_s4, [#allocation3], %s362_s19, %s362_s19, %s363_s20  }
  0xee   :  { %s334_s23 = scalar_lea.vmem %s429_s11, 512  ;;  %p339_p9 = scmp.lt.s32.totalorder %s429_s11, %s429_s11 }
  0xef   :  { %p335_p8 = scmp.ne.s32.totalorder %s429_s11, %s334_s23  ;;  %p340_p10 = scmp.lt.s32.totalorder %s334_s23, %s334_s23 }
  0xf1   :  { %p341_p11 = por %p340_p10, %p339_p9 }
  0xf3   :  { %p342_p12 = pnand %p341_p11, %p335_p8 }
  0xf5   :  { %345 = shalt.err (!%p342_p12)
}
  0xf6   :  { %s346_s26 = scalar_lea.hbm %s465_s5, 512 }
  0xf7   :  { %p347_p13 = scmp.ne.s32.totalorder %s465_s5, %s346_s26  ;;  %p350_p0 = scmp.lt.u32.totalorder %s346_s26, %s465_s5 }
  0xf9   :  { %p352_p1 = pnand %p350_p0, %p347_p13 }
  0xfb   :  { %355 = shalt.err (!%p352_p1)
}
  0xfc   :  { %250 = dma.vmem_to_hbm [thread:$0]  %s429_s11, 512, %s465_s5, [#allocation5], %s362_s19, %s362_s19, %s363_s20  }
  0xfd   :  { %356 = dma.done.wait [#allocation3], 512  }
  0xfe   :  { %357 = vsyncadd [#allocation3], 4294966784 }
  0xff   :  { %358 = dma.done.wait [#allocation5], 512  }
 0x100   :  { %359 = vsyncadd [#allocation5], 4294966784 }
 0x101   :  { %257 = vsyncpa [#allocation3], 1 }
 0x102   :  { %258 = vsyncpa [#allocation5], 1 }

</bundles_post_ra>
